<compile_context>
chip_gen: v6e
topology: v6e:2x2x1
jax: 0.10.0
libtpu: 0.0.40
codegen_flags: <defaults>
</compile_context>

<pallas_src>
import functools

import jax
import jax.numpy as jnp
from jax.experimental import pallas as pl
from jax.experimental.pallas import tpu as pltpu

_LANES = 128


def _pool_kernel(x_ref, o_ref, max_acc, sum_acc, *,
                 s_true, s_tile, acc_w, has_partial):
    # x_ref   : (r_tile, s_tile)  one row per (batch, channel) pair
    # o_ref   : (r_tile, 2)       col 0 = max pool, col 1 = avg pool (f32)
    # max_acc : (r_tile, acc_w)   running max, input dtype (lane-parallel)
    # sum_acc : (r_tile, acc_w)   running sum, f32       (lane-parallel)
    s = pl.program_id(1)
    n_s = pl.num_programs(1)
    rows = x_ref.shape[0]
    n_chunks = s_tile // acc_w

    @pl.when(s == 0)
    def _init():
        max_acc[...] = jnp.full_like(max_acc, -jnp.inf)
        sum_acc[...] = jnp.zeros_like(sum_acc)

    def _accumulate(masked):
        if masked:
            lane = jax.lax.broadcasted_iota(jnp.int32, (rows, acc_w), 1)
            base = s * s_tile
        m = None
        sm = None
        for k in range(n_chunks):  # static unroll; slice offsets are constants
            chunk = x_ref[:, k * acc_w:(k + 1) * acc_w]
            if masked:
                valid = (base + k * acc_w + lane) < s_true
                cmax = jnp.where(valid, chunk, jnp.asarray(-jnp.inf, chunk.dtype))
                csum = jnp.where(valid, chunk.astype(jnp.float32), 0.0)
            else:
                cmax = chunk
                csum = chunk.astype(jnp.float32)
            m = cmax if m is None else jnp.maximum(m, cmax)
            sm = csum if sm is None else sm + csum
        max_acc[...] = jnp.maximum(max_acc[...], m)
        sum_acc[...] = sum_acc[...] + sm

    if has_partial:
        # Unmasked fast path on full blocks; masked path only on the last
        # (partial) spatial block, where Pallas pads OOB reads with garbage.
        @pl.when(s != n_s - 1)
        def _fast():
            _accumulate(masked=False)

        @pl.when(s == n_s - 1)
        def _tail():
            _accumulate(masked=True)
    else:
        _accumulate(masked=False)

    @pl.when(s == n_s - 1)
    def _finalize():
        # Single cross-lane reduce per row block, off the streaming hot loop.
        # Every accumulator lane has seen >= 1 valid element, so no -inf leaks.
        row_max = jnp.max(max_acc[...].astype(jnp.float32), axis=-1, keepdims=True)
        row_avg = jnp.sum(sum_acc[...], axis=-1, keepdims=True) * (1.0 / s_true)
        o_ref[...] = jnp.concatenate([row_max, row_avg], axis=-1).astype(o_ref.dtype)


def _mlp_kernel(avg_ref, max_ref, w1_ref, w2_ref, o_ref):
    # avg_ref/max_ref: (B, C) f32; w1_ref: (Cr, C); w2_ref: (C, Cr); o_ref: (B, C)
    b = avg_ref.shape[0]
    w1 = w1_ref[...]
    w2 = w2_ref[...]
    # Shared MLP: stack [avg; max] -> one MXU pass per conv. Keep weights in
    # their native dtype; accumulate in f32 via preferred_element_type.
    p = jnp.concatenate([avg_ref[...], max_ref[...]], axis=0).astype(w1.dtype)
    h = jax.lax.dot_general(p, w1,
                            dimension_numbers=(((1,), (1,)), ((), ())),
                            preferred_element_type=jnp.float32)   # (2B, Cr)
    h = jnp.maximum(h, 0.0).astype(w2.dtype)                       # ReLU
    y = jax.lax.dot_general(h, w2,
                            dimension_numbers=(((1,), (1,)), ((), ())),
                            preferred_element_type=jnp.float32)   # (2B, C)
    o_ref[...] = jax.nn.sigmoid(y[:b] + y[b:]).astype(o_ref.dtype)


def _round_down(value, multiple):
    return (value // multiple) * multiple


def channel_attention(x, w1, w2, *, r_tile=None, s_tile=None):
    """CBAM channel attention. x: (B, C, H, W); w1: (C//r, C); w2: (C, C//r).

    Returns sigmoid(MLP(avgpool(x)) + MLP(maxpool(x))), shape (B, C, 1, 1).
    """
    B, C, H, W = x.shape
    S = H * W
    R = B * C
    itemsize = jnp.dtype(x.dtype).itemsize
    x2 = x.reshape(R, S)  # free view of contiguous NCHW

    # ---- tile selection (independent of C; rows = (batch, channel) pairs) ----
    vmem_target = 24 * 1024 * 1024       # x double-buffers + accumulators + out buffers
    acc_row = _LANES * (4 + itemsize)    # f32 sum + input-dtype max accumulators / row
    out_row = 2 * _LANES * 4             # (r_tile, 2) f32 out block, lane-padded, 2 bufs

    if r_tile is None:
        if R <= 8:
            r_tile = R                   # full-extent block (legal for any R)
        else:
            per_row = 2 * _LANES * itemsize + acc_row + out_row
            rows_cap = max(8, _round_down(vmem_target // per_row, 8))
            r_tile = min(_round_down(R, 8), rows_cap)
            # Keep >= 2 row blocks so v7x's second TensorCore gets work.
            if R >= 16 and pl.cdiv(R, r_tile) < 2:
                r_tile = max(8, _round_down(pl.cdiv(R, 2), 8))

    if S <= _LANES:
        s_tile = S                       # full-extent spatial block
    elif s_tile is None:
        fixed = r_tile * (acc_row + out_row)
        avail = max(vmem_target - fixed, 2 * r_tile * _LANES * itemsize)
        lanes = _round_down(avail // (2 * r_tile * itemsize), _LANES)
        s_tile = min(_round_down(S, _LANES), max(_LANES, lanes))
    else:
        assert s_tile % _LANES == 0 and s_tile <= S, "s_tile must be a multiple of 128"

    acc_w = s_tile if s_tile < _LANES else _LANES
    has_partial = (S % s_tile) != 0
    grid = (pl.cdiv(R, r_tile), pl.cdiv(S, s_tile))

    # Explicit scoped-VMEM limit (defaults: 16 MiB on v5e / 32 MiB on v6e, v7x).
    lane_pad = max(_LANES, pl.cdiv(s_tile, _LANES) * _LANES)
    row_pad = pl.cdiv(r_tile, 8) * 8
    vmem_need = (2 * row_pad * lane_pad * itemsize     # double-buffered x tiles
                 + row_pad * (acc_row + out_row))      # scratch + out buffers
    vmem_limit = int(max(vmem_need + (4 << 20), 16 << 20))

    kernel = functools.partial(_pool_kernel, s_true=S, s_tile=s_tile,
                               acc_w=acc_w, has_partial=has_partial)

    cost = pl.CostEstimate(
        flops=2 * R * S,
        transcendentals=0,
        bytes_accessed=R * S * itemsize + R * 2 * 4,
    )

    # NOTE: if R % r_tile != 0, OOB rows of the last row block carry garbage
    # through max/avg; rows are independent and OOB output rows are never
    # written back, so this is benign (floating-point x assumed for -inf fill).
    pooled = pl.pallas_call(
        kernel,
        out_shape=jax.ShapeDtypeStruct((R, 2), jnp.float32),
        grid_spec=pltpu.PrefetchScalarGridSpec(
            num_scalar_prefetch=0,
            grid=grid,
            in_specs=[pl.BlockSpec((r_tile, s_tile), lambda r, s: (r, s))],
            out_specs=pl.BlockSpec((r_tile, 2), lambda r, s: (r, 0)),
            scratch_shapes=[
                pltpu.VMEM((r_tile, acc_w), x.dtype),      # running max
                pltpu.VMEM((r_tile, acc_w), jnp.float32),  # running sum
            ],
        ),
        compiler_params=pltpu.CompilerParams(
            dimension_semantics=("parallel", "arbitrary"),
            vmem_limit_bytes=vmem_limit,
        ),
        cost_estimate=cost,
    )(x2)

    pooled_max = pooled[:, 0].reshape(B, C)
    pooled_avg = pooled[:, 1].reshape(B, C)

    attn = pl.pallas_call(
        _mlp_kernel,
        out_shape=jax.ShapeDtypeStruct((B, C), x.dtype),
    )(pooled_avg, pooled_max, w1, w2)

    return attn.reshape(B, C, 1, 1)


def reference(x, w1, w2):
    # Pure-JAX reference of the PyTorch forward.
    pooled_max = jnp.max(x, axis=(2, 3))
    pooled_avg = jnp.mean(x, axis=(2, 3))

    def mlp(p):
        h = jnp.maximum(p @ w1.T, 0.0)
        return h @ w2.T

    out = jax.nn.sigmoid(mlp(pooled_avg) + mlp(pooled_max))
    return out[:, :, None, None]


if __name__ == "__main__":
    # Shapes implied by the module: (batch, in_channels, H, W); reduction_ratio=2.
    B, C, H, W = 2, 4, 16, 16
    reduction_ratio = 2
    Cr = C // reduction_ratio

    key = jax.random.PRNGKey(0)
    kx, k1, k2, kx2 = jax.random.split(key, 4)

    x = jax.random.normal(kx, (B, C, H, W), dtype=jnp.float32)
    # Conv2d 1x1 (bias=False) weights: shapes (Cr, C) and (C, Cr).
    w1 = jax.random.normal(k1, (Cr, C), dtype=jnp.float32) * 0.1
    w2 = jax.random.normal(k2, (C, Cr), dtype=jnp.float32) * 0.1

    # Force two spatial blocks (s_tile=128 over S=256) so the cross-step
    # running max/sum accumulation (unmasked fast path) is exercised.
    out = jax.block_until_ready(channel_attention(x, w1, w2, s_tile=128))
    ref = reference(x, w1, w2)
    assert out.shape == (B, C, 1, 1)
    assert jnp.allclose(out, ref, atol=1e-5, rtol=1e-5)

    # Ragged spatial extent (S=200 with s_tile=128) exercises the masked tail.
    xr = jax.random.normal(kx2, (B, C, 10, 20), dtype=jnp.float32)
    out_r = jax.block_until_ready(channel_attention(xr, w1, w2, s_tile=128))
    ref_r = reference(xr, w1, w2)
    assert jnp.allclose(out_r, ref_r, atol=1e-5, rtol=1e-5)

    print("KERNEL_OK")
</pallas_src>

<mosaic_0001>
module attributes {stable_mosaic.version = 11 : i64} {
  func.func @_pool_kernel(%arg0: i32, %arg1: i32, %arg2: memref<8x128xf32, #tpu.memory_space<vmem>>, %arg3: memref<8x2xf32, #tpu.memory_space<vmem>>, %arg4: memref<8x128xf32, #tpu.memory_space<vmem>>, %arg5: memref<8x128xf32, #tpu.memory_space<vmem>>) attributes {dimension_semantics = [#tpu.dimension_semantics<parallel>, #tpu.dimension_semantics<arbitrary>], iteration_bounds = array<i64: 1, 2>, scalar_prefetch = 0 : i64, scratch_operands = 2 : i64, tpu.core_type = #tpu.core_type<tc>, window_params = [{transform_indices = @transform_0, window_bounds = array<i64: 8, 128>}, {transform_indices = @transform_1, window_bounds = array<i64: 8, 2>}]} {
    %c0_i32 = arith.constant 0 : i32
    %0 = arith.cmpi eq, %arg1, %c0_i32 : i32
    %1 = arith.extui %0 : i1 to i32
    %c0_i32_0 = arith.constant 0 : i32
    %2 = arith.cmpi ne, %1, %c0_i32_0 : i32
    scf.if %2 {
      %cst = arith.constant 0xFF800000 : f32
      %13 = vector.broadcast %cst : f32 to vector<8x128xf32>
      %c0_11 = arith.constant 0 : index
      %c0_12 = arith.constant 0 : index
      %14 = vector.load %arg4[%c0_11, %c0_12] : memref<8x128xf32, #tpu.memory_space<vmem>>, vector<8x128xf32>
      tpu.vector_store %arg4[%c0_11, %c0_12], %13 {strides = array<i32>} : memref<8x128xf32, #tpu.memory_space<vmem>>, vector<8x128xf32>,
      %cst_13 = arith.constant 0.000000e+00 : f32
      %15 = vector.broadcast %cst_13 : f32 to vector<8x128xf32>
      %c0_14 = arith.constant 0 : index
      %c0_15 = arith.constant 0 : index
      %16 = vector.load %arg5[%c0_14, %c0_15] : memref<8x128xf32, #tpu.memory_space<vmem>>, vector<8x128xf32>
      tpu.vector_store %arg5[%c0_14, %c0_15], %15 {strides = array<i32>} : memref<8x128xf32, #tpu.memory_space<vmem>>, vector<8x128xf32>,
    } else {
    }
    %c0 = arith.constant 0 : index
    %c0_1 = arith.constant 0 : index
    %3 = vector.load %arg2[%c0, %c0_1] : memref<8x128xf32, #tpu.memory_space<vmem>>, vector<8x128xf32>
    %c0_2 = arith.constant 0 : index
    %c0_3 = arith.constant 0 : index
    %4 = vector.load %arg4[%c0_2, %c0_3] : memref<8x128xf32, #tpu.memory_space<vmem>>, vector<8x128xf32>
    %5 = arith.maximumf %4, %3 : vector<8x128xf32>
    %c0_4 = arith.constant 0 : index
    %c0_5 = arith.constant 0 : index
    %6 = vector.load %arg4[%c0_4, %c0_5] : memref<8x128xf32, #tpu.memory_space<vmem>>, vector<8x128xf32>
    tpu.vector_store %arg4[%c0_4, %c0_5], %5 {strides = array<i32>} : memref<8x128xf32, #tpu.memory_space<vmem>>, vector<8x128xf32>,
    %c0_6 = arith.constant 0 : index
    %c0_7 = arith.constant 0 : index
    %7 = vector.load %arg5[%c0_6, %c0_7] : memref<8x128xf32, #tpu.memory_space<vmem>>, vector<8x128xf32>
    %8 = arith.addf %7, %3 : vector<8x128xf32>
    %c0_8 = arith.constant 0 : index
    %c0_9 = arith.constant 0 : index
    %9 = vector.load %arg5[%c0_8, %c0_9] : memref<8x128xf32, #tpu.memory_space<vmem>>, vector<8x128xf32>
    tpu.vector_store %arg5[%c0_8, %c0_9], %8 {strides = array<i32>} : memref<8x128xf32, #tpu.memory_space<vmem>>, vector<8x128xf32>,
    %c1_i32 = arith.constant 1 : i32
    %10 = arith.cmpi eq, %arg1, %c1_i32 : i32
    %11 = arith.extui %10 : i1 to i32
    %c0_i32_10 = arith.constant 0 : i32
    %12 = arith.cmpi ne, %11, %c0_i32_10 : i32
    scf.if %12 {
      %c0_11 = arith.constant 0 : index
      %c0_12 = arith.constant 0 : index
      %13 = vector.load %arg4[%c0_11, %c0_12] : memref<8x128xf32, #tpu.memory_space<vmem>>, vector<8x128xf32>
      %cst = arith.constant dense<0xFF800000> : vector<8xf32>
      %14 = vector.multi_reduction <maximumf>, %13, %cst [1] : vector<8x128xf32> to vector<8xf32>
      %15 = vector.shape_cast %14 : vector<8xf32> to vector<8x1xf32>
      %c0_13 = arith.constant 0 : index
      %c0_14 = arith.constant 0 : index
      %16 = vector.load %arg5[%c0_13, %c0_14] : memref<8x128xf32, #tpu.memory_space<vmem>>, vector<8x128xf32>
      %cst_15 = arith.constant dense<0.000000e+00> : vector<8xf32>
      %17 = vector.multi_reduction <add>, %16, %cst_15 [1] : vector<8x128xf32> to vector<8xf32>
      %18 = vector.shape_cast %17 : vector<8xf32> to vector<8x1xf32>
      %cst_16 = arith.constant 3.906250e-03 : f32
      %19 = vector.broadcast %cst_16 : f32 to vector<8x1xf32>
      %20 = arith.mulf %18, %19 : vector<8x1xf32>
      %21 = tpu.concatenate %15, %20 in 1 : vector<8x1xf32>, vector<8x1xf32> -> vector<8x2xf32>
      %c0_17 = arith.constant 0 : index
      %c0_18 = arith.constant 0 : index
      %22 = vector.load %arg3[%c0_17, %c0_18] : memref<8x2xf32, #tpu.memory_space<vmem>>, vector<8x2xf32>
      tpu.vector_store %arg3[%c0_17, %c0_18], %21 {strides = array<i32>} : memref<8x2xf32, #tpu.memory_space<vmem>>, vector<8x2xf32>,
    } else {
    }
    return
  }
  func.func @transform_0(%arg0: i32, %arg1: i32) -> (i32, i32) {
    %c0_i32 = arith.constant 0 : i32
    return %arg0, %arg1 : i32, i32
  }
  func.func @transform_1(%arg0: i32, %arg1: i32) -> (i32, i32) {
    %c0_i32 = arith.constant 0 : i32
    %c0_i32_0 = arith.constant 0 : i32
    return %arg0, %c0_i32 : i32, i32
  }
}

</mosaic_0001>

<bundles_post_ra>
// kernel: tpu_custom_call.1
= control target key start
LH: loop header
LB: loop body
LE: loop exit
PB: predicated region body
PF: predicated region fallthrough
CT: control target
= control target key end

     0   :  { %6 = vsyncpa [#allocation5], 0  ;;  %s510_s0 = inlined_call_operand.hbm [shape: f32[8,256], index: 0, kind: input, shape index: {}]   ;;  %s511_s1 = inlined_call_operand.vmem [shape: f32[8,2], index: 1, kind: output, shape index: {}]  }
   0x1   :  { %8 = vsyncpa [#allocation5 + $0x1], 0  ;;  %s410_s6 = smov 0   ;;  %s412_s7 = smov 0  }
   0x2   :  { %s414_s8 = smov 0   ;;  %s416_s9 = smov 0  }
   0x3   :  { %s418_s10 = smov 0   ;;  %s420_s11 = smov 0  }
   0x4 LB: > { %s248_s12 = sadd.s32 4294967295, %s395_s11   ;;  %s23_s13 = sadd.s32 1, %s391_s10  ;;  %s395_s11 = sphi %s420_s11, %s14_s11   ;;  %s391_s10 = sphi %s418_s10, %s519_s10   ;;  %s387_s9 = sphi %s416_s9, %s518_s9   ;;  %s383_s8 = sphi %s414_s8, %s517_s8   ;;  %s379_s7 = sphi %s412_s7, %s516_s7   ;;  %s375_s6 = sphi %s410_s6, %s515_s6  }
   0x5   : > { %p24_p0 = scmp.ge.s32.totalorder %s23_s13, 2  ;;  %s35_s14 = sadd.s32 1, %s383_s8 }
   0x6   : > { %p42_p1 = scmp.ne.s32.totalorder %s383_s8, %s379_s7  ;;  %p43_p2 = scmp.eq.s32.totalorder %s395_s11, 0 }
   0x7   : > { %s521_s13 = smov (%p24_p0, %s23_s13), 0  ;;  %p48_p4 = scmp.ne.s32.totalorder %s379_s7, %s375_s6 }
   0x8   : > { %p446_p3 = por %p43_p2, %p42_p1  ;;  %s31_s16 = ssub.s32 %s391_s10, %s521_s13 }
   0x9   : > { %p49_p5 = scmp.eq.s32.totalorder %s248_s12, 0  ;;  %p33_p6 = scmp.eq.s32.totalorder %s31_s16, 0 }
   0xa   : > { %p266_p8 = scmp.lt.s32.totalorder %s395_s11, 2  ;;  %s98_s19 = sand.u32 1, %s383_s8  }
   0xb   : > { %p453_p7 = por %p49_p5, %p48_p4  ;;  %s252_s20 = sshll.u32 %s391_s10, 7 }
   0xc   : > { %s459_s18 = scalar_select %p33_p6, %s383_s8, %s35_s14  }
   0xd   : > { %s251_s21 = sshll.u32 %s98_s19, 3  ;;  %s109_s24 = scalar_lea.hbm %s510_s0, %s252_s20 }
   0xe   : > { %s102_s25 = scalar_lea.vmem [#allocation4], %s251_s21  ;;  %p468_p9 = pnand %p266_p8, %p446_p3 }
   0xf   : > { %s111_s26 = sshll.u32 %s102_s25, 4  ;;  %p253_p10 = scmp.ge.s32.totalorder %s395_s11, 1  ;;  %s112_s26 = int_to_ptr.vmem [resolvable:$true] %s111_s26 }
  0x10   : > { %p116_p11 = scmp.lt.s32.totalorder %s395_s11, 3  ;;  %s99_s28 = scalar_lea.sflag [#allocation5], %s98_s19 }
  0x11   : > { %p319_p12 = pneg %p468_p9  ;;  %s330_s29 = scalar_lea.vmem %s112_s26, 128 }
  0x12   : > { %p331_p13 = scmp.ne.s32.totalorder %s112_s26, %s330_s29  ;;  %s397_s30 = smov [#allocation4]  }
  0x13   : > { %s335_s2 = sshll.u32 %s397_s30, 4  ;;  %s336_s2 = int_to_ptr.vmem [resolvable:$false] %s335_s2 }
  0x14   : > { %p333_p0 = pnand %p331_p13, %p319_p12  ;;  %s337_s3 = scalar_lea.vmem %s336_s2, 256 }
  0x15   : > { %p338_p2 = scmp.lt.s32.totalorder %s112_s26, %s336_s2  ;;  %p339_p3 = scmp.lt.s32.totalorder %s337_s3, %s330_s29 }
  0x16   : > { %p334_p1 = pneg %p333_p0 }
  0x17   : > { %p340_p4 = por %p339_p3, %p338_p2 }
  0x19   : > { %p341_p5 = pnand %p340_p4, %p334_p1 }
  0x1b   : > { %344 = shalt.err (!%p341_p5)
}
  0x1c   : > { %265 = dma.hbm_to_vmem [thread:$0]  (!%p468_p9), %s109_s24, 128, %s112_s26, %s99_s28  }
  0x1d   : > { %p117_p6 = pnand %p253_p10, %p116_p11 }
  0x1e   : > { %s122_s4 = sand.u32 (!%p117_p6), 1, %s379_s7  }
  0x1f   : > { %120 = sbr.rel (%p117_p6) target bundleno = 207 (0xcf), region = 24  ;;  %s254_s5 = sshll.u32 (!%p117_p6), %s122_s4, 3 }
  0x20   : > { %s123_s6 = scalar_lea.sflag (!%p117_p6), [#allocation5], %s122_s4  ;;  %s126_s12 = scalar_lea.vmem (!%p117_p6), [#allocation4], %s254_s5 }
  0x24   : > { %370 = dma.done.wait (%p453_p7), %s123_s6, 128  }
  0x25   : > { %372 = vsyncadd (%p453_p7), %s123_s6, 4294967168  ;;  %p255_p8 = scmp.ne.s32.totalorder %s387_s9, 0 }
  0x27   : > { %151 = sbr.rel (%p255_p8) target bundleno = 46 (0x2e), region = 32 }
  0x2c   : > { %v398_v0 = vmov -inf   ;;  %v399_v1 = vmov 0.0  }
  0x2d   : > { %152 = vst [vmem:[#allocation2] sm:$0xff] %v398_v0  ;;  %153 = vst [vmem:[#allocation3] sm:$0xff] %v399_v1 }
  0x2e PF: > { %v154_v2 = vld [vmem:[%s126_s12] sm:$0xff]  ;;  %p256_p9 = scmp.ne.s32.totalorder %s387_s9, 1 }
  0x33   : > { %164 = sbr.rel (%p256_p9) target bundleno = 207 (0xcf), region = 36 }
  0x34   : > { %v155_v3 = vld [vmem:[#allocation2] sm:$0xff]  ;;  %v158_v4 = vld [vmem:[#allocation3] sm:$0xff] }
  0x35   : > { %v156_v5 = vmax.f32 %v155_v3, %v154_v2  ;;  %v159_v6 = vadd.f32 %v158_v4, %v154_v2 }
  0x37   : > { %157 = vst [vmem:[#allocation2] sm:$0xff] %v156_v5  ;;  %160 = vst [vmem:[#allocation3] sm:$0xff] %v159_v6 }
  0x38   : > { %vm172_vm0 = vcmask 7168   ;;  %vm174_vm1 = vcmask 15360  }
  0x3e   : > { %v168_v7 = vld [vmem:[#allocation3] sm:$0xff]  ;;  %v165_v8 = vld [vmem:[#allocation2] sm:$0xff] }
  0x3f   : > { %169 = vadd.xlane.f32.xlu0 %v168_v7 }
  0x43   : > { %166 = vmax.xlane.f32.xlu0 %v165_v8 }
  0xc8   : > { %v170_v9 = vpop.xlane.xlu0 %169 }
  0xc9   : > { %v171_v10 = vmul.f32 0.00390625, %v170_v9 }
  0xcc   : > { %v167_v11 = vpop.xlane.xlu0 %166 }
  0xcd   : > { %v173_v12 = vsel %vm172_vm0, %v167_v11, %v171_v10 }
  0xce   : > { %175 = vst.msk [vmem:[%s511_s1] sm:$0xff] %vm174_vm1, %v173_v12 }
  0xcf PF: > { %s14_s11 = sadd.s32 1, %s395_s11   ;;  %s515_s6 = smov %s379_s7 }
  0xd0   : > { %p11_p7 = scmp.ge.s32.totalorder %s14_s11, 4   ;;  %s516_s7 = smov %s383_s8 }
  0xd1   : > { %s517_s8 = smov %s459_s18  ;;  %s518_s9 = smov %s391_s10 }
  0xd2   : > { %s519_s10 = smov %s521_s13  ;;  %13 = sbr.rel (!%p11_p7) target bundleno = 4 (0x4), region = 72 }
  0xd7   :  { %195 = vsyncpa [#allocation5], 1 }
  0xd8   :  { %197 = vsyncpa [#allocation5 + $0x1], 1 }

</bundles_post_ra>
